<compile_context>
chip_gen: v6e
topology: v6e:2x2x1
jax: 0.10.0
libtpu: 0.0.40
codegen_flags: <defaults>
</compile_context>

<pallas_src>
import jax
import jax.numpy as jnp
from jax.experimental import pallas as pl
from jax.experimental.pallas import tpu as pltpu


def conv1x1_vpu_kernel(w_ref, b_ref, x_ref, o_ref):
    # w_ref: (Cout*Cin,) f32 in SMEM, row-major (w[c, k] at c*Cin + k)
    # b_ref: (Cout,)     f32 in SMEM, already bias - 1.0
    # x_ref: (Cin, M)    f32 in VMEM, M lane-dense
    # o_ref: (Cout, M)   f32 in VMEM
    xv = x_ref[...]                      # single full-tile load
    cin = xv.shape[0]
    cout = o_ref.shape[0]

    # Unrolled VPU channel contraction: Cout*Cin broadcast mul-adds.
    rows = []
    for c in range(cout):
        acc = xv[0:1, :] * w_ref[c * cin + 0] + b_ref[c]
        for k in range(1, cin):
            acc = acc + xv[k:k + 1, :] * w_ref[c * cin + k]
        rows.append(acc)

    o_ref[...] = jnp.concatenate(rows, axis=0)   # single store for all rows


@jax.jit
def conv1x1_stride2_pad2_minus1(x_nchw, weight, bias):
    """Equivalent of torch.nn.Conv2d(3, 2, 1, stride=2, padding=2)(x) - 1.0.

    x_nchw : (N, Cin, H, W) float32
    weight : (Cout, Cin, 1, 1) float32
    bias   : (Cout,) float32
    returns: (N, Cout, Hout, Wout) float32
    """
    N, Cin, H, W = x_nchw.shape
    Cout = weight.shape[0]
    pad, stride = 2, 2
    Hout = (H + 2 * pad - 1) // stride + 1
    Wout = (W + 2 * pad - 1) // stride + 1
    M = N * Hout * Wout

    # Output index o reads padded-input position o*stride - pad; positions
    # with a valid (non-pad) source lie in [o_min, o_max].
    def interior(size):
        o_min = -(-pad // stride)                 # ceil(pad / stride)
        o_max = (size - 1 + pad) // stride
        n = o_max - o_min + 1
        s0 = o_min * stride - pad                 # first valid source index
        return o_min, n, s0

    oh0, nh, sh0 = interior(H)
    ow0, nw, sw0 = interior(W)

    # --- minimal glue (fused by jit / allow_input_fusion): channel-major,
    # strided interior pick, pad into the (Hout, Wout) frame ---
    x_cm = jnp.moveaxis(x_nchw, 1, 0)             # (Cin, N, H, W); free for N=1
    x_int = x_cm[:, :,
                 sh0:sh0 + (nh - 1) * stride + 1:stride,
                 sw0:sw0 + (nw - 1) * stride + 1:stride]   # (Cin, N, nh, nw)
    x_frame = jnp.pad(
        x_int,
        ((0, 0), (0, 0),
         (oh0, Hout - oh0 - nh),
         (ow0, Wout - ow0 - nw)))                 # (Cin, N, Hout, Wout)
    x_flat = x_frame.reshape(Cin, M).astype(jnp.float32)   # (Cin, M) lane-dense

    w_flat = weight.reshape(Cout * Cin).astype(jnp.float32)  # (6,)  -> SMEM
    b_eff = (bias - 1.0).astype(jnp.float32)                 # (2,)  -> SMEM

    cost = pl.CostEstimate(
        flops=2 * Cout * Cin * M,
        transcendentals=0,
        bytes_accessed=(Cin * M + Cout * M) * 4 + (Cout * Cin + Cout) * 4,
    )

    out_flat = pl.pallas_call(
        conv1x1_vpu_kernel,
        out_shape=jax.ShapeDtypeStruct((Cout, M), jnp.float32),
        in_specs=[
            pl.BlockSpec(memory_space=pltpu.MemorySpace.SMEM),   # weights
            pl.BlockSpec(memory_space=pltpu.MemorySpace.SMEM),   # bias - 1.0
            pl.BlockSpec(memory_space=pltpu.MemorySpace.VMEM),   # X (full array)
        ],
        out_specs=pl.BlockSpec(memory_space=pltpu.MemorySpace.VMEM),
        compiler_params=pltpu.CompilerParams(
            allow_input_fusion=[False, False, True]),
        cost_estimate=cost,
    )(w_flat, b_eff, x_flat)

    out = out_flat.reshape(Cout, N, Hout, Wout)
    return jnp.moveaxis(out, 0, 1)                # (N, Cout, Hout, Wout); free for N=1


def reference(x_nchw, weight, bias):
    # Pure-JAX reference (same math) for a sanity check.
    out = jax.lax.conv_general_dilated(
        x_nchw, weight,
        window_strides=(2, 2),
        padding=((2, 2), (2, 2)),
        dimension_numbers=("NCHW", "OIHW", "NCHW"),
    )
    return out + bias.reshape(1, -1, 1, 1) - 1.0


if __name__ == "__main__":
    key = jax.random.PRNGKey(0)
    k_x, k_w, k_b = jax.random.split(key, 3)

    # Shapes implied by the module: input (1, 3, 28, 28), Conv2d(3, 2, 1, ...)
    x = jax.random.normal(k_x, (1, 3, 28, 28), dtype=jnp.float32)
    weight = jax.random.normal(k_w, (2, 3, 1, 1), dtype=jnp.float32) * 0.1
    bias = jax.random.normal(k_b, (2,), dtype=jnp.float32) * 0.1

    out = conv1x1_stride2_pad2_minus1(x, weight, bias)
    out = jax.block_until_ready(out)

    ref = jax.block_until_ready(reference(x, weight, bias))
    assert out.shape == (1, 2, 16, 16), out.shape
    assert jnp.allclose(out, ref, atol=1e-5, rtol=1e-5)

    print("KERNEL_OK")
</pallas_src>

<mosaic_0001>
module attributes {stable_mosaic.version = 11 : i64} {
  func.func @conv1x1_vpu_kernel(%arg0: memref<6xf32, #tpu.memory_space<smem>>, %arg1: memref<2xf32, #tpu.memory_space<smem>>, %arg2: memref<3x256xf32, #tpu.memory_space<vmem>>, %arg3: memref<2x256xf32, #tpu.memory_space<vmem>>) attributes {dimension_semantics = [], scalar_prefetch = 0 : i64, scratch_operands = 0 : i64, tpu.core_type = #tpu.core_type<tc>} {
    %c0 = arith.constant 0 : index
    %c0_0 = arith.constant 0 : index
    %0 = vector.load %arg2[%c0, %c0_0] : memref<3x256xf32, #tpu.memory_space<vmem>>, vector<3x256xf32>
    %1 = vector.extract_strided_slice %0 {offsets = [0, 0], sizes = [1, 256], strides = [1, 1]} : vector<3x256xf32> to vector<1x256xf32>
    %c0_1 = arith.constant 0 : index
    %2 = memref.load %arg0[%c0_1] : memref<6xf32, #tpu.memory_space<smem>>
    %3 = vector.broadcast %2 : f32 to vector<1x256xf32>
    %4 = arith.mulf %1, %3 : vector<1x256xf32>
    %c0_2 = arith.constant 0 : index
    %5 = memref.load %arg1[%c0_2] : memref<2xf32, #tpu.memory_space<smem>>
    %6 = vector.broadcast %5 : f32 to vector<1x256xf32>
    %7 = arith.addf %4, %6 : vector<1x256xf32>
    %8 = vector.extract_strided_slice %0 {offsets = [1, 0], sizes = [1, 256], strides = [1, 1]} : vector<3x256xf32> to vector<1x256xf32>
    %c1 = arith.constant 1 : index
    %9 = memref.load %arg0[%c1] : memref<6xf32, #tpu.memory_space<smem>>
    %10 = vector.broadcast %9 : f32 to vector<1x256xf32>
    %11 = arith.mulf %8, %10 : vector<1x256xf32>
    %12 = arith.addf %7, %11 : vector<1x256xf32>
    %13 = vector.extract_strided_slice %0 {offsets = [2, 0], sizes = [1, 256], strides = [1, 1]} : vector<3x256xf32> to vector<1x256xf32>
    %c2 = arith.constant 2 : index
    %14 = memref.load %arg0[%c2] : memref<6xf32, #tpu.memory_space<smem>>
    %15 = vector.broadcast %14 : f32 to vector<1x256xf32>
    %16 = arith.mulf %13, %15 : vector<1x256xf32>
    %17 = arith.addf %12, %16 : vector<1x256xf32>
    %18 = vector.extract_strided_slice %0 {offsets = [0, 0], sizes = [1, 256], strides = [1, 1]} : vector<3x256xf32> to vector<1x256xf32>
    %c3 = arith.constant 3 : index
    %19 = memref.load %arg0[%c3] : memref<6xf32, #tpu.memory_space<smem>>
    %20 = vector.broadcast %19 : f32 to vector<1x256xf32>
    %21 = arith.mulf %18, %20 : vector<1x256xf32>
    %c1_3 = arith.constant 1 : index
    %22 = memref.load %arg1[%c1_3] : memref<2xf32, #tpu.memory_space<smem>>
    %23 = vector.broadcast %22 : f32 to vector<1x256xf32>
    %24 = arith.addf %21, %23 : vector<1x256xf32>
    %25 = vector.extract_strided_slice %0 {offsets = [1, 0], sizes = [1, 256], strides = [1, 1]} : vector<3x256xf32> to vector<1x256xf32>
    %c4 = arith.constant 4 : index
    %26 = memref.load %arg0[%c4] : memref<6xf32, #tpu.memory_space<smem>>
    %27 = vector.broadcast %26 : f32 to vector<1x256xf32>
    %28 = arith.mulf %25, %27 : vector<1x256xf32>
    %29 = arith.addf %24, %28 : vector<1x256xf32>
    %30 = vector.extract_strided_slice %0 {offsets = [2, 0], sizes = [1, 256], strides = [1, 1]} : vector<3x256xf32> to vector<1x256xf32>
    %c5 = arith.constant 5 : index
    %31 = memref.load %arg0[%c5] : memref<6xf32, #tpu.memory_space<smem>>
    %32 = vector.broadcast %31 : f32 to vector<1x256xf32>
    %33 = arith.mulf %30, %32 : vector<1x256xf32>
    %34 = arith.addf %29, %33 : vector<1x256xf32>
    %35 = tpu.concatenate %17, %34 in 0 : vector<1x256xf32>, vector<1x256xf32> -> vector<2x256xf32>
    %c0_4 = arith.constant 0 : index
    %c0_5 = arith.constant 0 : index
    %36 = vector.load %arg3[%c0_4, %c0_5] : memref<2x256xf32, #tpu.memory_space<vmem>>, vector<2x256xf32>
    tpu.vector_store %arg3[%c0_4, %c0_5], %35 {strides = array<i32>} : memref<2x256xf32, #tpu.memory_space<vmem>>, vector<2x256xf32>,
    return
  }
}

</mosaic_0001>

<bundles_post_ra>
// kernel: conv1x1_stride2_pad2_minus1.1
= control target key start
LH: loop header
LB: loop body
LE: loop exit
PB: predicated region body
PF: predicated region fallthrough
CT: control target
= control target key end

     0   :  { %8 = vsyncpa [#allocation3], 0  ;;  %s202_s0 = inlined_call_operand.vmem [shape: f32[6], index: 0, kind: input, shape index: {}]   ;;  %s203_s1 = inlined_call_operand.vmem [shape: f32[2], index: 1, kind: input, shape index: {}]   ;;  %s204_s2 = inlined_call_operand.vmem [shape: f32[3,256], index: 2, kind: input, shape index: {}]   ;;  %s205_s3 = inlined_call_operand.vmem [shape: f32[2,256], index: 3, kind: output, shape index: {}]  }
   0x1   :  { %s16_s14 = sshll.u32 %s202_s0, 4  ;;  %s17_s14 = int_to_ptr.vmem [resolvable:$true] %s16_s14 }
   0x2   :  { %9 = vsyncpa [#allocation5], 0  ;;  %s26_s17 = sshll.u32 %s203_s1, 4  ;;  %s140_s18 = scalar_lea.vmem %s17_s14, 16  ;;  %s27_s17 = int_to_ptr.vmem [resolvable:$true] %s26_s17 }
   0x3   :  { %p141_p0 = scmp.ne.s32.totalorder %s17_s14, %s140_s18  ;;  %p145_p1 = scmp.lt.s32.totalorder %s17_s14, %s17_s14 }
   0x4   :  { %p146_p2 = scmp.lt.s32.totalorder %s140_s18, %s140_s18 }
   0x6   :  { %p147_p3 = por %p146_p2, %p145_p1 }
   0x8   :  { %p148_p4 = pnand %p147_p3, %p141_p0 }
   0xa   :  { %151 = shalt.err (!%p148_p4)
}
   0xb   :  { %s168_s19 = smov [#allocation2]   ;;  %s152_s20 = scalar_lea.vmem %s27_s17, 16 }
   0xc   :  { %19 = dma.vmem_to_smem %s17_s14, 16, %s168_s19, [#allocation3]  }
   0xd   :  { %p153_p5 = scmp.ne.s32.totalorder %s27_s17, %s152_s20  ;;  %p157_p6 = scmp.lt.s32.totalorder %s27_s17, %s27_s17 }
   0xe   :  { %p158_p7 = scmp.lt.s32.totalorder %s152_s20, %s152_s20 }
  0x10   :  { %p159_p8 = por %p158_p7, %p157_p6 }
  0x12   :  { %p160_p9 = pnand %p159_p8, %p153_p5 }
  0x14   :  { %163 = shalt.err (!%p160_p9)
}
  0x15   :  { %s169_s0 = smov [#allocation4]  }
  0x16   :  { %29 = dma.vmem_to_smem %s27_s17, 16, %s169_s0, [#allocation5]  }
  0x17   :  { %164 = dma.done.wait [#allocation3], 16  }
  0x18   :  { %165 = vsyncadd [#allocation3], 4294967280 }
  0x19   :  { %166 = dma.done.wait [#allocation5], 16  }
  0x1a   :  { %167 = vsyncadd [#allocation5], 4294967280 }
  0x1b   :  { %38 = sfence }
  0x1c   :  { %s40_s1 = sld [smem:[#allocation2]]  ;;  %v39_v0 = vld [vmem:[%s204_s2] sm:$0x77]  ;;  %v85_v4 = vlaneseq  ;;  %vm106_vm0 = vcmask 1040384  }
  0x1d   :  { %s43_s21 = sld [smem:[#allocation4]] }
  0x1e   :  { %s127_s22 = sld [smem:[#allocation2 + $0x1]]  ;;  %v86_v14 = vshrl.u32 %v85_v4, 7 }
  0x1f   :  { %s129_s23 = sld [smem:[#allocation2 + $0x2]] }
  0x20   :  { %s131_s26 = sld [smem:[#allocation2 + $0x3]]  ;;  %v87_v24 = vsub.s32 0, %v86_v14  ;;  %v91_v25 = vsub.s32 4, %v86_v14 }
  0x21   :  { %s132_s27 = sld [smem:[#allocation4 + $0x1]] }
  0x22   :  { %v41_v1 = vstv %s40_s1  ;;  %s133_s28 = sld [smem:[#allocation2 + $0x4]] }
  0x23   :  { %v42_v2 = vmul.f32 %v41_v1, %v39_v0  ;;  %v44_v3 = vstv %s43_s21  ;;  %s135_s29 = sld [smem:[#allocation2 + $0x5]] }
  0x24   :  { %v47_v5 = vstv %s127_s22 }
  0x25   :  { %v45_v6 = vadd.f32 %v44_v3, %v42_v2  ;;  %v48_v7 = vmul.f32 %v47_v5, %v39_v0  ;;  %v55_v8 = vstv %s129_s23 }
  0x26   :  { %v56_v9 = vmul.f32 %v55_v8, %v39_v0  ;;  %v63_v10 = vstv %s131_s26 }
  0x27   :  { %v128_v11 = vrot.slane %v48_v7, 9  ;;  %v64_v12 = vmul.f32 %v63_v10, %v39_v0  ;;  %v66_v13 = vstv %s132_s27 }
  0x28   :  { %v130_v15 = vrot.slane %v56_v9, 10  ;;  %v69_v16 = vstv %s133_s28 }
  0x29   :  { %v53_v17 = vadd.f32 %v128_v11, %v45_v6  ;;  %v67_v18 = vadd.f32 %v66_v13, %v64_v12  ;;  %v70_v19 = vmul.f32 %v69_v16, %v39_v0  ;;  %v77_v20 = vstv %s135_s29 }
  0x2a   :  { %v78_v21 = vmul.f32 %v77_v20, %v39_v0 }
  0x2b   :  { %v61_v22 = vadd.f32 %v130_v15, %v53_v17  ;;  %v134_v23 = vrot.slane %v70_v19, 9 }
  0x2c   :  { %v136_v26 = vrot.slane %v78_v21, 10 }
  0x2d   :  { %v75_v27 = vadd.f32 %v134_v23, %v67_v18  ;;  %v88_v29 = vrot.slane %v61_v22, %v87_v24  ;;  %v92_v30 = vrot.slane %v61_v22, %v91_v25 }
  0x2f   :  { %v83_v28 = vadd.f32 %v136_v26, %v75_v27 }
  0x31   :  { %v99_v31 = vrot.slane %v83_v28, %v87_v24  ;;  %v103_v32 = vrot.slane %v83_v28, %v91_v25 }
  0x33   :  { %v107_v33 = vsel %vm106_vm0, %v88_v29, %v99_v31  ;;  %v108_v34 = vsel %vm106_vm0, %v92_v30, %v103_v32 }
  0x34   :  { %v111_v35 = vcombine.low %v107_v33, %v108_v34 }
  0x36   :  { %137 = vst.sshfl [vmem:[%s205_s3] sm:$0x33 pattern:$0x76325410] %v111_v35 }
  0x37   :  { %125 = vsyncpa [#allocation3], 1 }
  0x38   :  { %126 = vsyncpa [#allocation5], 1 }

</bundles_post_ra>
